<compile_context>
chip_gen: v7x
topology: tpu7x:2x2x1
jax: 0.10.0
libtpu: 0.0.40
codegen_flags: <defaults>
</compile_context>

<pallas_src>
import jax
import jax.numpy as jnp
from jax.experimental import pallas as pl
from jax.experimental.pallas import tpu as pltpu

C_IN = 64
C_MID = 64
C_OUT = 1
TM_MAX = 4096          # pixels (lanes) per grid step; (64, 4096) f32 = 1 MiB
BN_EPS = 1e-5


def _detection_branch_kernel(x_ref, w1_ref, b1_ref, w2_ref, b2_ref, o_ref):
    # x_ref : (64, TM)  activation tile — channels on sublanes, pixels on lanes
    # w1_ref: (64, 64)  conv1 weight with BatchNorm scale folded in
    # b1_ref: (64, 1)   conv1 bias + BatchNorm shift (folded), lane-broadcast
    # w2_ref: (1, 64)   conv2 weight
    # b2_ref: (1, 1)    conv2 bias
    # o_ref : (1, TM)   lane-dense output tile (already NCHW order)
    h = jnp.dot(w1_ref[...], x_ref[...], preferred_element_type=jnp.float32)
    h = jnp.maximum(h + b1_ref[...], 0.0)                      # bias+BN+ReLU
    o = jnp.dot(w2_ref[...], h, preferred_element_type=jnp.float32)
    o_ref[...] = (o + b2_ref[...]).astype(o_ref.dtype)


def detection_branch_forward(x_nchw, params, *, compute_dtype=jnp.float32,
                             tm_max=TM_MAX):
    """x_nchw: (N, 64, H, W) float32 -> (N, 1, H, W) float32.

    Weights follow the PyTorch Conv2d convention (C_out, C_in) with the
    trailing 1x1 kernel dims squeezed.  BatchNorm runs in eval mode.
    """
    N, C, H, W = x_nchw.shape
    assert C == C_IN, f"DetectionBranch expects 64 input channels, got {C}"
    HW = H * W
    x3 = x_nchw.reshape(N, C_IN, HW)          # free view, stays in NCHW order

    # --- fold conv1 bias + eval-mode BatchNorm into W1 / b1 -----------------
    bn_scale = params["gamma"] / jnp.sqrt(params["run_var"] + BN_EPS)   # (64,)
    bn_shift = params["beta"] - params["run_mean"] * bn_scale           # (64,)
    w1f = params["w1"] * bn_scale[:, None]            # (64, 64), per-out-chan
    b1f = (params["b1"] * bn_scale + bn_shift).reshape(C_MID, 1)
    w2 = params["w2"].reshape(C_OUT, C_MID)
    b2 = params["b2"].reshape(C_OUT, 1)

    # --- choose spatial tile -------------------------------------------------
    # Prefer the full row (no padding; legal for any HW since the block equals
    # the full array dim).  Keep the grid >= 2 steps when cheap so v7x megacore
    # can shard across both TensorCores.
    if HW <= tm_max:
        if N == 1 and HW >= 256 and HW % 256 == 0:
            tm = HW // 2                       # 2 lane-aligned spatial tiles
        else:
            tm = HW
        hw_pad = HW
    else:
        tm = tm_max
        hw_pad = ((HW + tm - 1) // tm) * tm
        if hw_pad != HW:
            # TODO(synk): ragged tail is padded (rare); a pl.when-guarded
            # partial last tile would avoid this extra HBM copy.
            x3 = jnp.pad(x3, ((0, 0), (0, 0), (0, hw_pad - HW)))

    if compute_dtype != jnp.float32:
        x3 = x3.astype(compute_dtype)
        w1f = w1f.astype(compute_dtype)

    grid = (N, hw_pad // tm)

    out = pl.pallas_call(
        _detection_branch_kernel,
        out_shape=jax.ShapeDtypeStruct((N, C_OUT, hw_pad), jnp.float32),
        grid_spec=pltpu.PrefetchScalarGridSpec(
            num_scalar_prefetch=0,
            grid=grid,
            in_specs=[
                pl.BlockSpec((None, C_IN, tm), lambda n, s: (n, 0, s)),   # x
                pl.BlockSpec((C_MID, C_IN), lambda n, s: (0, 0)),         # W1'
                pl.BlockSpec((C_MID, 1), lambda n, s: (0, 0)),            # b1'
                pl.BlockSpec((C_OUT, C_MID), lambda n, s: (0, 0)),        # W2
                pl.BlockSpec((C_OUT, 1), lambda n, s: (0, 0)),            # b2
            ],
            out_specs=pl.BlockSpec((None, C_OUT, tm), lambda n, s: (n, 0, s)),
        ),
        compiler_params=pltpu.CompilerParams(
            dimension_semantics=("parallel", "parallel")),
    )(x3, w1f, b1f, w2, b2)

    if hw_pad != HW:
        out = out[:, :, :HW]
    return out.reshape(N, C_OUT, H, W)


def init_params(key):
    """Deterministic params matching the PyTorch module's layouts.

    Conv2d(64,64,1) weight (64,64,1,1) is stored as (C_out, C_in) = (64,64);
    Conv2d(64,1,1) weight as (1,64).  (Importing real torch weights only needs
    the 1x1 kernel dims squeezed — no transpose.)
    """
    k1, k2, k3, k4, k5, k6, k7, k8 = jax.random.split(key, 8)
    w1 = jax.random.normal(k1, (C_MID, C_IN), jnp.float32) * 0.05
    b1 = jax.random.normal(k2, (C_MID,), jnp.float32) * 0.05
    gamma = 1.0 + 0.1 * jax.random.normal(k3, (C_MID,), jnp.float32)
    beta = 0.05 * jax.random.normal(k4, (C_MID,), jnp.float32)
    run_mean = jax.random.normal(k5, (C_MID,), jnp.float32) * 0.01
    run_var = jnp.ones((C_MID,), jnp.float32) + 0.1 * jax.random.uniform(
        k6, (C_MID,), jnp.float32)
    w2 = jax.random.normal(k7, (C_OUT, C_MID), jnp.float32) * 0.05
    b2 = jax.random.normal(k8, (C_OUT,), jnp.float32) * 0.05
    return dict(w1=w1, b1=b1, gamma=gamma, beta=beta,
                run_mean=run_mean, run_var=run_var, w2=w2, b2=b2)


def _reference(x_nchw, params):
    """Pure-JAX reference with the module's unfused structure (eval-mode BN)."""
    N, C, H, W = x_nchw.shape
    x = x_nchw.reshape(N, C, H * W)
    h = jnp.einsum("oc,ncs->nos", params["w1"], x) + params["b1"][None, :, None]
    scale = params["gamma"] / jnp.sqrt(params["run_var"] + BN_EPS)
    shift = params["beta"] - params["run_mean"] * scale
    h = jnp.maximum(h * scale[None, :, None] + shift[None, :, None], 0.0)
    o = jnp.einsum("oc,ncs->nos", params["w2"], h) + params["b2"][None, :, None]
    return o.reshape(N, C_OUT, H, W)


if __name__ == "__main__":
    key = jax.random.PRNGKey(0)
    kx, kp = jax.random.split(key)
    N, H, W = 2, 16, 16                      # channels fixed at 64 by the module
    x = jax.random.normal(kx, (N, C_IN, H, W), jnp.float32)
    params = init_params(kp)

    out = jax.block_until_ready(detection_branch_forward(x, params))
    ref = _reference(x, params)
    assert out.shape == (N, 1, H, W), out.shape
    # BN is folded into W1 inside the kernel (mathematically exact); the small
    # tolerance covers TPU default matmul-precision differences vs the
    # unfused f32 reference.
    assert jnp.allclose(out, ref, atol=5e-3, rtol=5e-3), "f32 mismatch vs reference"

    # Optional bf16 streaming of x / W1 (f32 accumulation): the kernel is
    # HBM-bound so halving input bytes is ~2x end-to-end; looser tolerance.
    out_bf16 = jax.block_until_ready(
        detection_branch_forward(x, params, compute_dtype=jnp.bfloat16))
    assert out_bf16.shape == (N, 1, H, W)
    assert jnp.allclose(out_bf16, ref, atol=5e-2, rtol=5e-2), "bf16 mismatch"

    print("KERNEL_OK")
</pallas_src>

<mosaic_0001>
module attributes {stable_mosaic.version = 11 : i64} {
  func.func @_detection_branch_kernel(%arg0: i32, %arg1: i32, %arg2: memref<1x64x256xf32, #tpu.memory_space<vmem>>, %arg3: memref<64x64xf32, #tpu.memory_space<vmem>>, %arg4: memref<64x1xf32, #tpu.memory_space<vmem>>, %arg5: memref<1x64xf32, #tpu.memory_space<vmem>>, %arg6: memref<1x1xf32, #tpu.memory_space<vmem>>, %arg7: memref<1x1x256xf32, #tpu.memory_space<vmem>>) attributes {dimension_semantics = [#tpu.dimension_semantics<parallel>, #tpu.dimension_semantics<parallel>], iteration_bounds = array<i64: 2, 1>, scalar_prefetch = 0 : i64, scratch_operands = 0 : i64, tpu.core_type = #tpu.core_type<tc>, window_params = [{transform_indices = @transform_0, window_bounds = array<i64: 1, 64, 256>}, {pipeline_mode = #tpu.pipeline_mode<synchronous>, transform_indices = @transform_1, window_bounds = array<i64: 64, 64>}, {pipeline_mode = #tpu.pipeline_mode<synchronous>, transform_indices = @transform_2, window_bounds = array<i64: 64, 1>}, {pipeline_mode = #tpu.pipeline_mode<synchronous>, transform_indices = @transform_3, window_bounds = array<i64: 1, 64>}, {pipeline_mode = #tpu.pipeline_mode<synchronous>, transform_indices = @transform_4, window_bounds = array<i64: 1, 1>}, {transform_indices = @transform_5, window_bounds = array<i64: 1, 1, 256>}]} {
    %c0 = arith.constant 0 : index
    %c0_0 = arith.constant 0 : index
    %0 = vector.load %arg3[%c0, %c0_0] : memref<64x64xf32, #tpu.memory_space<vmem>>, vector<64x64xf32>
    %c0_1 = arith.constant 0 : index
    %c0_2 = arith.constant 0 : index
    %c0_3 = arith.constant 0 : index
    %1 = vector.load %arg2[%c0_1, %c0_2, %c0_3] : memref<1x64x256xf32, #tpu.memory_space<vmem>>, vector<1x64x256xf32>
    %2 = vector.shape_cast %1 : vector<1x64x256xf32> to vector<64x256xf32>
    %cst = arith.constant dense<0.000000e+00> : vector<64x256xf32>
    %3 = tpu.matmul %0, %2, %cst {dimension_numbers = #tpu.dot_dimension_numbers<[1], [0], [0], [1], [0, 0, 1, 1], [], []>} : vector<64x64xf32>, vector<64x256xf32>, vector<64x256xf32> -> vector<64x256xf32>
    %c0_4 = arith.constant 0 : index
    %c0_5 = arith.constant 0 : index
    %4 = vector.load %arg4[%c0_4, %c0_5] : memref<64x1xf32, #tpu.memory_space<vmem>>, vector<64x1xf32>
    %5 = vector.broadcast %4 : vector<64x1xf32> to vector<64x256xf32>
    %6 = arith.addf %3, %5 : vector<64x256xf32>
    %cst_6 = arith.constant 0.000000e+00 : f32
    %7 = vector.broadcast %cst_6 : f32 to vector<64x256xf32>
    %8 = arith.maximumf %6, %7 : vector<64x256xf32>
    %c0_7 = arith.constant 0 : index
    %c0_8 = arith.constant 0 : index
    %9 = vector.load %arg5[%c0_7, %c0_8] : memref<1x64xf32, #tpu.memory_space<vmem>>, vector<1x64xf32>
    %cst_9 = arith.constant dense<0.000000e+00> : vector<1x256xf32>
    %10 = tpu.matmul %9, %8, %cst_9 {dimension_numbers = #tpu.dot_dimension_numbers<[1], [0], [0], [1], [0, 0, 1, 1], [], []>} : vector<1x64xf32>, vector<64x256xf32>, vector<1x256xf32> -> vector<1x256xf32>
    %c0_10 = arith.constant 0 : index
    %c0_11 = arith.constant 0 : index
    %11 = vector.load %arg6[%c0_10, %c0_11] : memref<1x1xf32, #tpu.memory_space<vmem>>, vector<1x1xf32>
    %12 = vector.broadcast %11 : vector<1x1xf32> to vector<1x256xf32>
    %13 = arith.addf %10, %12 : vector<1x256xf32>
    %c0_12 = arith.constant 0 : index
    %c0_13 = arith.constant 0 : index
    %c0_14 = arith.constant 0 : index
    %14 = vector.load %arg7[%c0_12, %c0_13, %c0_14] : memref<1x1x256xf32, #tpu.memory_space<vmem>>, vector<1x1x256xf32>
    %15 = vector.shape_cast %14 : vector<1x1x256xf32> to vector<1x256xf32>
    %16 = vector.shape_cast %13 : vector<1x256xf32> to vector<1x1x256xf32>
    tpu.vector_store %arg7[%c0_12, %c0_13, %c0_14], %16 {strides = array<i32>} : memref<1x1x256xf32, #tpu.memory_space<vmem>>, vector<1x1x256xf32>,
    return
  }
  func.func @transform_0(%arg0: i32, %arg1: i32) -> (i32, i32, i32) {
    %c0_i32 = arith.constant 0 : i32
    %c0_i32_0 = arith.constant 0 : i32
    return %arg0, %c0_i32, %arg1 : i32, i32, i32
  }
  func.func @transform_1(%arg0: i32, %arg1: i32) -> (i32, i32) {
    %c0_i32 = arith.constant 0 : i32
    %c0_i32_0 = arith.constant 0 : i32
    %c0_i32_1 = arith.constant 0 : i32
    return %c0_i32, %c0_i32_0 : i32, i32
  }
  func.func @transform_2(%arg0: i32, %arg1: i32) -> (i32, i32) {
    %c0_i32 = arith.constant 0 : i32
    %c0_i32_0 = arith.constant 0 : i32
    %c0_i32_1 = arith.constant 0 : i32
    return %c0_i32, %c0_i32_0 : i32, i32
  }
  func.func @transform_3(%arg0: i32, %arg1: i32) -> (i32, i32) {
    %c0_i32 = arith.constant 0 : i32
    %c0_i32_0 = arith.constant 0 : i32
    %c0_i32_1 = arith.constant 0 : i32
    return %c0_i32, %c0_i32_0 : i32, i32
  }
  func.func @transform_4(%arg0: i32, %arg1: i32) -> (i32, i32) {
    %c0_i32 = arith.constant 0 : i32
    %c0_i32_0 = arith.constant 0 : i32
    %c0_i32_1 = arith.constant 0 : i32
    return %c0_i32, %c0_i32_0 : i32, i32
  }
  func.func @transform_5(%arg0: i32, %arg1: i32) -> (i32, i32, i32) {
    %c0_i32 = arith.constant 0 : i32
    %c0_i32_0 = arith.constant 0 : i32
    return %arg0, %c0_i32, %arg1 : i32, i32, i32
  }
}

</mosaic_0001>

<bundles_post_ra>
// kernel: tpu_custom_call.1
= control target key start
LH: loop header
LB: loop body
LE: loop exit
PB: predicated region body
PF: predicated region fallthrough
CT: control target
= control target key end

     0   :  { %s1242_s0 = inlined_call_operand.hbm [shape: f32[2,64,256], index: 0, kind: input, shape index: {}]   ;;  %s1243_s1 = inlined_call_operand.vmem [shape: f32[64,64], index: 1, kind: input, shape index: {}]   ;;  %s1244_s2 = inlined_call_operand.vmem [shape: f32[64,1], index: 2, kind: input, shape index: {}]   ;;  %s1245_s3 = inlined_call_operand.vmem [shape: f32[1,64], index: 3, kind: input, shape index: {}]   ;;  %s1246_s4 = inlined_call_operand.<no memory space> [shape: f32[1,1], index: 4, kind: input, shape index: {}]   ;;  %s1247_s5 = inlined_call_operand.hbm [shape: f32[2,1,256], index: 5, kind: output, shape index: {}]  }
   0x1   :  { %v10_v0 = vstv %s1246_s4 }
   0x2   :  { %11 = vst [vmem:[#allocation2] sm:$0x1] %v10_v0 }
   0x3   :  { %12 = vsyncpa [#allocation4], 0 }
   0x4   :  { %14 = vsyncpa [#allocation4 + $0x1], 0 }
   0x5   :  { %15 = vsyncpa [#allocation5], 0 }
   0x6   :  { %17 = vsyncpa [#allocation5 + $0x1], 0  ;;  %s981_s20 = smov 0   ;;  %s983_s21 = smov 0  }
   0x7   :  { %s985_s22 = smov 0   ;;  %s987_s23 = smov 0  }
   0x8   :  { %s989_s24 = smov 0   ;;  %s991_s25 = smov 0  }
   0x9 LB: > { %s700_s4 = sadd.s32 4294967295, %s939_s25   ;;  %s701_s26 = sadd.s32 4294967294, %s939_s25   ;;  %s939_s25 = sphi %s991_s25, %s23_s25   ;;  %s935_s24 = sphi %s989_s24, %s1262_s24   ;;  %s931_s23 = sphi %s987_s23, %s1261_s23   ;;  %s927_s22 = sphi %s985_s22, %s1260_s22   ;;  %s923_s21 = sphi %s983_s21, %s1259_s21   ;;  %s919_s20 = sphi %s981_s20, %s1258_s20  }
   0xa   : > { %s35_s27 = sadd.s32 1, %s935_s24  ;;  %s44_s28 = sadd.s32 1, %s927_s22 }
   0xb   : > { %p37_p0 = scmp.ge.s32.totalorder %s35_s27, 2  ;;  %p51_p1 = scmp.ne.s32.totalorder %s927_s22, %s923_s21 }
   0xc   : > { %p52_p2 = scmp.eq.s32.totalorder %s939_s25, 0  ;;  %p57_p3 = scmp.ne.s32.totalorder %s923_s21, %s919_s20 }
   0xd   : > { %s1264_s27 = smov (%p37_p0, %s35_s27), 0  ;;  %p58_p5 = scmp.eq.s32.totalorder %s700_s4, 0 }
   0xe   : > { %p1022_p4 = por %p52_p2, %p51_p1  ;;  %s39_s30 = ssub.s32 %s935_s24, %s1264_s27 }
   0xf   : > { %p167_p6 = scmp.eq.s32.totalorder %s700_s4, 1  ;;  %p42_p7 = scmp.eq.s32.totalorder %s39_s30, 0 }
  0x10   : > { %p1028_p8 = por %p58_p5, %p57_p3  ;;  %p173_p10 = scmp.eq.s32.totalorder %s701_s26, 1 }
  0x11   : > { %p1032_p9 = por %p167_p6, %p51_p1  ;;  %p770_p13 = scmp.lt.s32.totalorder %s939_s25, 2 }
  0x12   : > { %s1037_s8 = scalar_select %p42_p7, %s927_s22, %s44_s28  }
  0x13   : > { %s1251_s7 = scalar_select %p1032_p9, 1, 0 }
  0x14   : > { %p1039_p11 = por %p173_p10, %p57_p3  ;;  %s205_s10 = sand.u32 1, %s927_s22  }
  0x15   : > { %s704_s11 = sshll.u32 %s205_s10, 7  ;;  %s724_s12 = sshll.u32 %s935_s24, 11 }
  0x16   : > { %s1252_s9 = scalar_select %p1039_p11, 1, 0 }
  0x17   : > { %s1050_s15 = scalar_lea.hbm %s1242_s0, %s724_s12  ;;  %s209_s16 = scalar_lea.vmem [#allocation3], %s704_s11 }
  0x18   : > { %s218_s17 = sshll.u32 %s209_s16, 4  ;;  %p1056_p0 = pnand %p770_p13, %p1022_p4  ;;  %s1052_s17 = int_to_ptr.vmem [resolvable:$true] %s218_s17 }
  0x19   : > { %s1061_s19 = scalar_lea.sflag [#allocation4], %s205_s10  ;;  %s827_s4 = scalar_lea.hbm %s1050_s15, 2048 }
  0x1a   : > { %p828_p2 = scmp.ne.s32.totalorder %s1050_s15, %s827_s4  ;;  %p829_p3 = pneg %p1056_p0 }
  0x1b   : > { %s832_s29 = scalar_lea.hbm %s1242_s0, 4096  ;;  %p833_p4 = scmp.lt.u32.totalorder %s1050_s15, %s1242_s0 }
  0x1c   : > { %p830_p5 = pnand %p829_p3, %p828_p2  ;;  %p834_p7 = scmp.lt.u32.totalorder %s832_s29, %s827_s4 }
  0x1d   : > { %p836_p13 = scmp.lt.u32.totalorder %s827_s4, %s1050_s15 }
  0x1e   : > { %p831_p6 = pneg %p830_p5  ;;  %p835_p10 = por %p834_p7, %p833_p4 }
  0x20   : > { %p837_p12 = por %p836_p13, %p835_p10 }
  0x22   : > { %p838_p1 = pnand %p837_p12, %p831_p6 }
  0x24   : > { %841 = shalt.err (!%p838_p1)
}
  0x25   : > { %s842_s10 = scalar_lea.vmem %s1052_s17, 2048  ;;  %s941_s12 = smov [#allocation3]  }
  0x26   : > { %p843_p2 = scmp.ne.s32.totalorder %s1052_s17, %s842_s10  ;;  %s847_s13 = sshll.u32 %s941_s12, 4  ;;  %s848_s13 = int_to_ptr.vmem [resolvable:$false] %s847_s13 }
  0x27   : > { %s849_s14 = scalar_lea.vmem %s848_s13, 4096  ;;  %p850_p9 = scmp.lt.s32.totalorder %s1052_s17, %s848_s13 }
  0x28   : > { %p845_p5 = pnand %p843_p2, %p829_p3  ;;  %p851_p4 = scmp.lt.s32.totalorder %s849_s14, %s842_s10 }
  0x2a   : > { %p846_p11 = pneg %p845_p5  ;;  %p852_p7 = por %p851_p4, %p850_p9 }
  0x2c   : > { %p853_p10 = pnand %p852_p7, %p846_p11 }
  0x2e   : > { %856 = shalt.err (!%p853_p10)
}
  0x2f   : > { %s942_s16 = smov 256   ;;  %s943_s4 = smov 16  }
  0x30   : > { %765 = dma.hbm_to_vmem [thread:$0]  (!%p1056_p0), %s1050_s15, 2048, %s1052_s17, %s1061_s19, %s942_s16, %s942_s16, %s943_s4  }
  0x31   : > { %p226_p12 = scmp.lt.s32.totalorder %s939_s25, 3  ;;  %p1254_p1 = scmp.ge.s32.totalorder %s939_s25, 1 }
  0x33   : > { %p227_p3 = pnand %p1254_p1, %p226_p12 }
  0x34   : > { %s1093_s26 = sand.u32 (!%p227_p3), 1, %s923_s21  }
  0x35   : > { %230 = sbr.rel (%p227_p3) target bundleno = 566 (0x236), region = 40  ;;  %s708_s28 = sshll.u32 (!%p227_p3), %s1093_s26, 7 }
  0x36   : > { %s233_s29 = scalar_lea.sflag (!%p227_p3), [#allocation4], %s1093_s26  ;;  %s1097_s30 = scalar_lea.vmem (!%p227_p3), [#allocation3], %s708_s28 }
  0x3c   : > { %910 = dma.done.wait (%p1028_p8), %s233_s29, 2048  }
  0x3d   : > { %912 = vsyncadd (%p1028_p8), %s233_s29, 4294965248  ;;  %v944_v1 = vmov 0.0   ;;  %v945_v2 = vmov 0   ;;  %v274_v3 = vld [vmem:[%s1097_s30 + $0x8] sm:$0xff]  ;;  %v276_v4 = vld [vmem:[%s1097_s30 + $0x18] sm:$0xff]  ;;  %vm337_vm0 = vcmask 523264  }
  0x3e   : > { %426 = vmatprep.mubr.f32.mxu0 %v944_v1  ;;  %825 = vset.pattern.permute.xlu0 %v945_v2  ;;  %v273_v5 = vld [vmem:[%s1097_s30] sm:$0xff]  ;;  %v726_v6 = vpack.c.bf16 %v276_v4, %v274_v3  ;;  %v275_v7 = vld [vmem:[%s1097_s30 + $0x10] sm:$0xff]  ;;  %v278_v8 = vld [vmem:[%s1097_s30 + $0x28] sm:$0xff]  ;;  %s709_s19 = sshll.u32 %s1093_s26, 1  ;;  %s725_s11 = sshll.u32 %s931_s23, 5 }
  0x3f   : > { %826 = vset.pattern.permute.xlu1 %v945_v2  ;;  %569 = vmatprep.mubr.f32.mxu1 %v944_v1  ;;  %v280_v9 = vld [vmem:[%s1097_s30 + $0x38] sm:$0xff]  ;;  %v728_v10 = vpack.c.bf16 %v275_v7, %v273_v5  ;;  %v277_v12 = vld [vmem:[%s1097_s30 + $0x20] sm:$0xff]  ;;  %v279_v13 = vld [vmem:[%s1097_s30 + $0x30] sm:$0xff]  ;;  %s262_s10 = scalar_lea.vmem [#allocation6], %s709_s19  ;;  %s1193_s16 = scalar_lea.hbm %s1247_s5, %s725_s11 }
  0x40   : > { %v730_v11 = vpack.c.bf16 %v280_v9, %v278_v8  ;;  %v282_v14 = vld [vmem:[%s1097_s30 + $0x48] sm:$0xff]  ;;  %727 = vmatprep.subr.bf16.mxu0 %v726_v6  ;;  %v284_v15 = vld [vmem:[%s1097_s30 + $0x58] sm:$0xff]  ;;  %v732_v16 = vpack.c.bf16 %v279_v13, %v277_v12  ;;  %v281_v18 = vld [vmem:[%s1097_s30 + $0x40] sm:$0xff]  ;;  %s616_s12 = sshll.u32 %s262_s10, 4  ;;  %s600_s4 = scalar_lea.sflag [#allocation5], %s1093_s26  ;;  %s1195_s12 = int_to_ptr.vmem [resolvable:$true] %s616_s12 }
  0x41   : > { %729 = vmatpush1.bf16.msra.mxu0 %v728_v10  ;;  %v734_v17 = vpack.c.bf16 %v284_v15, %v282_v14  ;;  %v283_v19 = vld [vmem:[%s1097_s30 + $0x50] sm:$0xff]  ;;  %v286_v20 = vld [vmem:[%s1097_s30 + $0x68] sm:$0xff]  ;;  %v288_v21 = vld [vmem:[%s1097_s30 + $0x78] sm:$0xff]  ;;  %s857_s28 = scalar_lea.vmem %s1195_s12, 32  ;;  %p1255_p9 = scmp.ne.s32.totalorder %s1251_s7, 0 }
  0x42   : > { %731 = vmatprep.subr.bf16.mxu0 %v730_v11  ;;  %v736_v22 = vpack.c.bf16 %v283_v19, %v281_v18  ;;  %v289_v23 = vld [vmem:[%s1244_s2] sm:$0xff]  ;;  %v291_v24 = vld [vmem:[%s1244_s2 + $0x10] sm:$0xff]  ;;  %v738_v25 = vpack.c.bf16 %v288_v21, %v286_v20  ;;  %v290_v28 = vld [vmem:[%s1244_s2 + $0x8] sm:$0xff]  ;;  %p858_p8 = scmp.ne.s32.totalorder %s1195_s12, %s857_s28  ;;  %s947_s23 = smov [#allocation6]  }
  0x43   : > { %v285_v26 = vld [vmem:[%s1097_s30 + $0x60] sm:$0xff]  ;;  %v287_v27 = vld [vmem:[%s1097_s30 + $0x70] sm:$0xff]  ;;  %299 = vperm.xlu0 %825, %v289_v23   ;;  %309 = vperm.xlu1 %826, %v291_v24   ;;  %v492_v37 = vld [vmem:[#allocation2] sm:$0x1]  ;;  %s861_s29 = sshll.u32 %s947_s23, 4  ;;  %s862_s29 = int_to_ptr.vmem [resolvable:$false] %s861_s29 }
  0x44   : > { %v292_v29 = vld [vmem:[%s1244_s2 + $0x18] sm:$0xff]  ;;  %v740_v30 = vpack.c.bf16 %v287_v27, %v285_v26  ;;  %v293_v31 = vld [vmem:[%s1244_s2 + $0x20] sm:$0xff]  ;;  %v294_v32 = vld [vmem:[%s1244_s2 + $0x28] sm:$0xff]  ;;  %p859_p11 = pnand %p858_p8, %p1255_p9  ;;  %s863_s30 = scalar_lea.vmem %s862_s29, 64 }
  0x45   : > { %733 = vmatpush1.bf16.msra.mxu0 %v732_v16  ;;  %v265_v33 = vld [vmem:[%s1243_s1] sm:$0xff]  ;;  %v295_v34 = vld [vmem:[%s1244_s2 + $0x30] sm:$0xff]  ;;  %v296_v35 = vld [vmem:[%s1244_s2 + $0x38] sm:$0xff]  ;;  %p864_p6 = scmp.lt.s32.totalorder %s1195_s12, %s862_s29  ;;  %p865_p13 = scmp.lt.s32.totalorder %s863_s30, %s857_s28 }
  0x46   : > { %735 = vmatprep.subr.bf16.mxu0 %v734_v17  ;;  %v266_v36 = vld [vmem:[%s1243_s1 + $0x8] sm:$0xff]  ;;  %v267_v38 = vld [vmem:[%s1243_s1 + $0x10] sm:$0xff]  ;;  %v268_v39 = vld [vmem:[%s1243_s1 + $0x18] sm:$0xff]  ;;  %p860_p0 = pneg %p859_p11 }
  0x47   : > { %304 = vperm.xlu0 %825, %v290_v28   ;;  %314 = vperm.xlu1 %826, %v292_v29   ;;  %v269_v40 = vld [vmem:[%s1243_s1 + $0x20] sm:$0xff]  ;;  %v270_v41 = vld [vmem:[%s1243_s1 + $0x28] sm:$0xff]  ;;  %v271_v42 = vld [vmem:[%s1243_s1 + $0x30] sm:$0xff]  ;;  %p866_p2 = por %p865_p13, %p864_p6 }
  0x48   : > { %v272_v43 = vld [vmem:[%s1243_s1 + $0x38] sm:$0xff] }
  0x49   : > { %737 = vmatpush1.bf16.msra.mxu0 %v736_v22  ;;  %p867_p5 = pnand %p866_p2, %p860_p0 }
  0x4a   : > { %739 = vmatprep.subr.bf16.mxu0 %v738_v25 }
  0x4b   : > { %319 = vperm.xlu0 %825, %v293_v31   ;;  %324 = vperm.xlu1 %826, %v294_v32  }
  0x4d   : > { %741 = vmatpush1.bf16.msra.mxu0 %v740_v30 }
  0x4f   : > { %329 = vperm.xlu0 %825, %v295_v34   ;;  %334 = vperm.xlu1 %826, %v296_v35  }
  0x50   : > { %710 = vmatmul.mubr.msk.f32.vlgmr.msra.gmra.mrb[0].mxu0 %vm337_vm0, %v265_v33 }
  0x51   : > { %432 = vmatprep.mubr.f32.mxu0 %v944_v1 }
  0x53   : > { %495 = vperm.xlu0 %825, %v492_v37  }
  0x54   : > { %711 = vmatmul.mubr.msk.f32.gmra.mrb[2].mxu0 %vm337_vm0, %v266_v36 }
  0x55   : > { %438 = vmatprep.mubr.f32.mxu0 %v944_v1 }
  0x58   : > { %712 = vmatmul.mubr.msk.f32.gmra.mrb[4].mxu0 %vm337_vm0, %v267_v38 }
  0x59   : > { %444 = vmatprep.mubr.f32.mxu0 %v944_v1 }
  0x5c   : > { %713 = vmatmul.mubr.msk.f32.gmra.mrb[6].mxu0 %vm337_vm0, %v268_v39 }
  0x5d   : > { %450 = vmatprep.mubr.f32.mxu0 %v944_v1 }
  0x60   : > { %714 = vmatmul.mubr.msk.f32.gmra.mrb[8].mxu0 %vm337_vm0, %v269_v40 }
  0x61   : > { %456 = vmatprep.mubr.f32.mxu0 %v944_v1 }
  0x64   : > { %715 = vmatmul.mubr.msk.f32.gmra.mrb[10].mxu0 %vm337_vm0, %v270_v41 }
  0x65   : > { %462 = vmatprep.mubr.f32.mxu0 %v944_v1 }
  0x68   : > { %716 = vmatmul.mubr.msk.f32.gmra.mrb[12].mxu0 %vm337_vm0, %v271_v42 }
  0x69   : > { %468 = vmatprep.mubr.f32.mxu0 %v944_v1 }
  0x6c   : > { %717 = vmatmul.mubr.msk.f32.gmra.mrb[14].mxu0 %vm337_vm0, %v272_v43 }
  0xc2   : > { %v300_v44 = vpop.permute.xlu0 %299  ;;  %v310_v53 = vpop.permute.xlu1 %309 }
  0xc6   : > { %v305_v48 = vpop.permute.xlu0 %304  ;;  %v315_v0 = vpop.permute.xlu1 %314 }
  0xca   : > { %v320_v13 = vpop.permute.xlu0 %319  ;;  %v325_v16 = vpop.permute.xlu1 %324 }
  0xce   : > { %v330_v29 = vpop.permute.xlu0 %329  ;;  %v335_v32 = vpop.permute.xlu1 %334 }
 0x123   : > { %v428_v45 = vpop.f32.mrb[0].mxu0 }
 0x124   : > { %v430_v46 = vpop.f32.mrb[1].mxu0  ;;  %v429_v47 = vadd.f32 %v428_v45, %v300_v44  ;;  %v498_v45 = vlaneseq }
 0x125   : > { %v431_v49 = vadd.f32 %v430_v46, %v300_v44  ;;  %v491_v44 = vld [vmem:[%s1245_s3] sm:$0x1] }
 0x126   : > { %v475_v55 = vmax.f32 %v429_v47, 0.0  ;;  %v499_v46 = vshrl.u32 %v498_v45, 7  ;;  %v946_v47 = vmov 1966171168   ;;  %vm596_vm1 = vcmp.lt.s32.totalorder %v498_v45, 256 }
 0x127   : > { %v434_v50 = vpop.f32.mrb[2].mxu0  ;;  %v476_v57 = vmax.f32 %v431_v49, 0.0 }
 0x128   : > { %v435_v51 = vadd.f32 %v434_v50, %v305_v48  ;;  %v436_v52 = vpop.f32.mrb[3].mxu0  ;;  %v500_v49 = vsub.s32 0, %v499_v46  ;;  %v496_v50 = vpop.permute.xlu0 %495 }
 0x129   : > { %v437_v54 = vadd.f32 %v436_v52, %v305_v48  ;;  %v580_v48 = vunpack.c.l.s4 %v946_v47 }
 0x12a   : > { %v477_v56 = vmax.f32 %v435_v51, 0.0  ;;  %v501_v52 = vrot.slane %v496_v50, %v500_v49 }
 0x12b   : > { %v478_v58 = vmax.f32 %v437_v54, 0.0  ;;  %v440_v59 = vpop.f32.mrb[4].mxu0  ;;  %v581_v51 = vunpack.c.0.s8 %v580_v48 }
 0x12c   : > { %v442_v60 = vpop.f32.mrb[5].mxu0  ;;  %v744_v61 = vpack.c.bf16 %v477_v56, %v475_v55  ;;  %v441_v63 = vadd.f32 %v440_v59, %v310_v53 }
 0x12d   : > { %v742_v62 = vpack.c.bf16 %v478_v58, %v476_v57  ;;  %v443_v1 = vadd.f32 %v442_v60, %v310_v53  ;;  %v584_v57 = vsub.s32 %v581_v51, %v499_v46 }
 0x12e   : > { %v479_v6 = vmax.f32 %v441_v63, 0.0 }
 0x12f   : > { %v446_v2 = vpop.f32.mrb[6].mxu0  ;;  %743 = vmatprep.subr.bf16.mxu1 %v742_v62  ;;  %v480_v8 = vmax.f32 %v443_v1, 0.0 }
 0x130   : > { %v447_v3 = vadd.f32 %v446_v2, %v315_v0  ;;  %v448_v4 = vpop.f32.mrb[7].mxu0  ;;  %745 = vmatpush1.bf16.msra.mxu1 %v744_v61 }
 0x131   : > { %v449_v5 = vadd.f32 %v448_v4, %v315_v0 }
 0x132   : > { %v481_v7 = vmax.f32 %v447_v3, 0.0 }
 0x133   : > { %v482_v9 = vmax.f32 %v449_v5, 0.0  ;;  %v452_v10 = vpop.f32.mrb[8].mxu0 }
 0x134   : > { %v748_v11 = vpack.c.bf16 %v481_v7, %v479_v6  ;;  %v454_v12 = vpop.f32.mrb[9].mxu0  ;;  %v453_v15 = vadd.f32 %v452_v10, %v320_v13 }
 0x135   : > { %v746_v14 = vpack.c.bf16 %v482_v9, %v480_v8  ;;  %v455_v17 = vadd.f32 %v454_v12, %v320_v13 }
 0x136   : > { %v483_v22 = vmax.f32 %v453_v15, 0.0 }
 0x137   : > { %v458_v18 = vpop.f32.mrb[10].mxu0  ;;  %747 = vmatprep.subr.bf16.mxu1 %v746_v14  ;;  %v484_v24 = vmax.f32 %v455_v17, 0.0 }
 0x138   : > { %v459_v19 = vadd.f32 %v458_v18, %v325_v16  ;;  %v460_v20 = vpop.f32.mrb[11].mxu0  ;;  %749 = vmatpush1.bf16.msra.mxu1 %v748_v11 }
 0x139   : > { %v461_v21 = vadd.f32 %v460_v20, %v325_v16 }
 0x13a   : > { %v485_v23 = vmax.f32 %v459_v19, 0.0 }
 0x13b   : > { %v486_v25 = vmax.f32 %v461_v21, 0.0  ;;  %v464_v26 = vpop.f32.mrb[12].mxu0 }
 0x13c   : > { %v752_v27 = vpack.c.bf16 %v485_v23, %v483_v22  ;;  %v466_v28 = vpop.f32.mrb[13].mxu0  ;;  %v465_v31 = vadd.f32 %v464_v26, %v330_v29 }
 0x13d   : > { %v750_v30 = vpack.c.bf16 %v486_v25, %v484_v24  ;;  %v467_v33 = vadd.f32 %v466_v28, %v330_v29 }
 0x13e   : > { %v487_v38 = vmax.f32 %v465_v31, 0.0 }
 0x13f   : > { %v470_v34 = vpop.f32.mrb[14].mxu0  ;;  %751 = vmatprep.subr.bf16.mxu1 %v750_v30  ;;  %v488_v40 = vmax.f32 %v467_v33, 0.0 }
 0x140   : > { %v471_v35 = vadd.f32 %v470_v34, %v335_v32  ;;  %v472_v36 = vpop.f32.mrb[15].mxu0  ;;  %753 = vmatpush1.bf16.msra.mxu1 %v752_v27 }
 0x141   : > { %v473_v37 = vadd.f32 %v472_v36, %v335_v32 }
 0x142   : > { %v489_v39 = vmax.f32 %v471_v35, 0.0 }
 0x143   : > { %v490_v41 = vmax.f32 %v473_v37, 0.0 }
 0x144   : > { %v756_v42 = vpack.c.bf16 %v489_v39, %v487_v38 }
 0x145   : > { %v754_v43 = vpack.c.bf16 %v490_v41, %v488_v40 }
 0x147   : > { %755 = vmatprep.subr.bf16.mxu1 %v754_v43 }
 0x148   : > { %757 = vmatpush1.bf16.msra.mxu1 %v756_v42 }
 0x14b   : > { %718 = vmatmul.mubr.msk.f32.vlgmr.msra.gmra.mrb[0].mxu1 %vm337_vm0, %v491_v44 }
 0x21e   : > { %v571_v53 = vpop.f32.mrb[0].mxu1 }
 0x21f   : > { %v572_v54 = vadd.f32 %v571_v53, %v501_v52  ;;  %v573_v55 = vpop.f32.mrb[1].mxu1 }
 0x220   : > { %v574_v56 = vadd.f32 %v573_v55, %v501_v52 }
 0x222   : > { %v578_v58 = vcombine.low %v572_v54, %v574_v56 }
 0x224   : > { %v585_v59 = vrot.slane %v578_v58, %v584_v57 }
 0x226   : > { %v592_v60 = vrot.slane %v585_v59, %v584_v57 }
 0x228   : > { %598 = vst.msk [vmem:[%s262_s10] sm:$0x3] %vm596_vm1, %v592_v60 }
 0x229   : > { %870 = shalt.err (!%p867_p5)
}
 0x22a   : > { %s871_s26 = scalar_lea.hbm %s1193_s16, 32  ;;  %s875_s17 = scalar_lea.hbm %s1247_s5, 64 }
 0x22b   : > { %p872_p4 = scmp.ne.s32.totalorder %s1193_s16, %s871_s26  ;;  %p876_p12 = scmp.lt.u32.totalorder %s1193_s16, %s1247_s5 }
 0x22c   : > { %p877_p1 = scmp.lt.u32.totalorder %s875_s17, %s871_s26  ;;  %p879_p8 = scmp.lt.u32.totalorder %s871_s26, %s1193_s16 }
 0x22d   : > { %p873_p7 = pnand %p872_p4, %p1255_p9 }
 0x22e   : > { %p878_p3 = por %p877_p1, %p876_p12 }
 0x22f   : > { %p874_p10 = pneg %p873_p7 }
 0x230   : > { %p880_p11 = por %p879_p8, %p878_p3 }
 0x232   : > { %p881_p0 = pnand %p880_p11, %p874_p10 }
 0x234   : > { %884 = shalt.err (!%p881_p0)
}
 0x235   : > { %760 = dma.vmem_to_hbm [thread:$0]  (%p1255_p9), %s1195_s12, 32, %s1193_s16, %s600_s4  }
 0x236 PF: > { %s628_s11 = sand.u32 1, %s919_s20   ;;  %p1256_p6 = scmp.ne.s32.totalorder %s1252_s9, 0 }
 0x237   : > { %p1257_p13 = scmp.ge.s32.totalorder %s939_s25, 2  ;;  %s629_s10 = scalar_lea.sflag [#allocation5], %s628_s11 }
 0x239   : > { %p767_p2 = pnand %p1257_p13, %p1256_p6 }
 0x23b   : > { %914 = dma.done.wait (!%p767_p2), %s629_s10, 32  }
 0x23c   : > { %916 = vsyncadd (!%p767_p2), %s629_s10, 4294967264  ;;  %s23_s25 = sadd.s32 1, %s939_s25   ;;  %s1258_s20 = smov %s923_s21 }
 0x23d   : > { %p20_p5 = scmp.ge.s32.totalorder %s23_s25, 4   ;;  %s1259_s21 = smov %s927_s22 }
 0x23e   : > { %s1260_s22 = smov %s1037_s8  ;;  %s1261_s23 = smov %s935_s24 }
 0x23f   : > { %s1262_s24 = smov %s1264_s27  ;;  %22 = sbr.rel (!%p20_p5) target bundleno = 9 (0x9), region = 85 }
 0x246   :  { %634 = vsyncpa [#allocation4], 1 }
 0x247   :  { %636 = vsyncpa [#allocation4 + $0x1], 1 }
 0x248   :  { %637 = vsyncpa [#allocation5], 1 }
 0x249   :  { %639 = vsyncpa [#allocation5 + $0x1], 1 }

</bundles_post_ra>
